<compile_context>
chip_gen: v6e
topology: v6e:2x2x1
jax: 0.10.0
libtpu: 0.0.40
codegen_flags: <defaults>
</compile_context>

<pallas_src>
import functools

import jax
import jax.numpy as jnp
from jax.experimental import pallas as pl
from jax.experimental.pallas import tpu as pltpu


def _rel_to_abs_kernel(rel_ref, init_ref, out_ref, *, nw_spixels, nh_spixels):
    nspix = nw_spixels * nh_spixels

    r = rel_ref[...].astype(jnp.int32)       # (1, TH, W)
    init = init_ref[...].astype(jnp.int32)   # (1, TH, W)

    # r in [0, 9): replace the constant-division lowering of r//3 and r%3 with
    # two compares + adds (maps 1:1 onto VALU slots).
    r_div3 = (r >= 3).astype(jnp.int32) + (r >= 6).astype(jnp.int32)
    r_h = r_div3 - 1
    r_w = (r - 3 * r_div3) - 1

    idx_h = init + r_h * nw_spixels
    invalid_h = (idx_h >= nspix) | (idx_h <= -1)
    idx_h = jnp.where(invalid_h, init, idx_h)

    # idx_h == init (mod nw) in both branches (r_h*nw is a multiple of nw; the
    # invalid fallback is init itself), so one modulo on init suffices.
    col = init % nw_spixels
    at_right_edge = (col == nw_spixels - 1) & (r_w == 1)
    at_left_edge = (col == 0) & (r_w == -1)
    # r_w == 1 and r_w == -1 are mutually exclusive, so a single OR is equivalent
    # to the reference's sequential if/elif.
    r_w = jnp.where(at_right_edge | at_left_edge, 0, r_w)

    idx_w = idx_h + r_w
    valid_w = (idx_w >= 0) & (idx_w < nspix)
    abs_idx = jnp.where(valid_w, idx_w, idx_h)

    out_ref[...] = abs_idx.astype(out_ref.dtype)


def _pick_tile_h(H, W, itemsize, target_bytes=1 << 20):
    """Largest TH that is a multiple of 8, divides H, and keeps a block <= ~1 MiB.

    Falls back to full-H blocks when H is not a multiple of 8 (full-dim blocks
    are always legal w.r.t. the (8, 128) constraint).
    """
    if H % 8 != 0:
        return H
    best = 8
    for th in range(8, H + 1, 8):
        if H % th == 0 and th * W * itemsize <= target_bytes:
            best = th
    return best


def rel_to_abs_index(rel_idx_map, init_idx_map, nw_spixels, nh_spixels):
    """rel_idx_map: (B, 1, H, W) float/int; init_idx_map: (1, 1, H, W) (or (1, H, W)).

    Returns (B, 1, H, W) with the same dtype as rel_idx_map (absolute spixel indices).
    """
    B, C, H, W = rel_idx_map.shape
    assert C == 1
    assert init_idx_map.shape[-2:] == (H, W)

    rel = rel_idx_map.reshape(B, H, W)
    init = init_idx_map.reshape(1, H, W)

    itemsize = jnp.dtype(rel_idx_map.dtype).itemsize
    th = _pick_tile_h(H, W, itemsize)
    n_h = H // th

    # Per-block VMEM estimate: 3 streams, double-buffered, plus int32 temps.
    block_bytes = th * W * max(itemsize, 4)
    vmem_limit = int(min(48 * 1024 * 1024, max(8 * 1024 * 1024, 12 * block_bytes)))

    kernel = functools.partial(
        _rel_to_abs_kernel, nw_spixels=nw_spixels, nh_spixels=nh_spixels
    )

    out = pl.pallas_call(
        kernel,
        out_shape=jax.ShapeDtypeStruct((B, H, W), rel_idx_map.dtype),
        # Batch innermost: init block index (0, h, 0) is constant across consecutive
        # steps, so the pipeliner skips the redundant init DMA per batch element.
        grid=(n_h, B),
        in_specs=[
            pl.BlockSpec((1, th, W), lambda h, b: (b, h, 0)),
            pl.BlockSpec((1, th, W), lambda h, b: (0, h, 0)),  # broadcast over batch
        ],
        out_specs=pl.BlockSpec((1, th, W), lambda h, b: (b, h, 0)),
        compiler_params=pltpu.CompilerParams(
            dimension_semantics=("parallel", "arbitrary"),
            vmem_limit_bytes=vmem_limit,
        ),
    )(rel, init)

    return out.reshape(B, 1, H, W)


def make_init_idx_map(H, W, nw_spixels, nh_spixels, dtype=jnp.float32):
    """Standard initial superpixel index map: regular nw x nh grid over the image."""
    ys = jnp.arange(H) * nh_spixels // H      # spixel row of each pixel row
    xs = jnp.arange(W) * nw_spixels // W      # spixel col of each pixel col
    idx = ys[:, None] * nw_spixels + xs[None, :]
    return idx.astype(dtype).reshape(1, 1, H, W)


def _reference(rel_idx_map, init_idx_map, nw, nh):
    """Pure-jnp reference of the same op (for a correctness check)."""
    nspix = nw * nh
    r = rel_idx_map.astype(jnp.int32)
    init = jnp.broadcast_to(init_idx_map.astype(jnp.int32), r.shape)
    r_h = r // 3 - 1
    r_w = r % 3 - 1
    idx_h = init + r_h * nw
    idx_h = jnp.where((idx_h >= nspix) | (idx_h <= -1), init, idx_h)
    r_w = jnp.where((((idx_h + 1) % nw) == 0) & (r_w == 1), 0, r_w)
    r_w = jnp.where(((idx_h % nw) == 0) & (r_w == -1), 0, r_w)
    idx_w = idx_h + r_w
    out = jnp.where((idx_w >= 0) & (idx_w < nspix), idx_w, idx_h)
    return out.astype(rel_idx_map.dtype)


if __name__ == "__main__":
    key = jax.random.PRNGKey(0)

    # Primary test: B=2, H=W=16, 4x4 superpixel grid.
    B, H, W = 2, 16, 16
    nw_spixels, nh_spixels = 4, 4
    k0, k1 = jax.random.split(key)

    # rel_idx_map: typically argmax over 9 neighbor-association channels, cast to float.
    rel_idx_map = jax.random.randint(k0, (B, 1, H, W), 0, 9).astype(jnp.float32)
    init_idx_map = make_init_idx_map(H, W, nw_spixels, nh_spixels)

    out = rel_to_abs_index(rel_idx_map, init_idx_map, nw_spixels, nh_spixels)
    out = jax.block_until_ready(out)
    ref = _reference(rel_idx_map, init_idx_map, nw_spixels, nh_spixels)
    assert out.shape == (B, 1, H, W)
    assert jnp.array_equal(out, ref)

    # Second test: H not a multiple of 8 (exercises the full-H block fallback).
    B2, H2, W2 = 2, 12, 16
    nw2, nh2 = 3, 3
    rel2 = jax.random.randint(k1, (B2, 1, H2, W2), 0, 9).astype(jnp.float32)
    init2 = make_init_idx_map(H2, W2, nw2, nh2)
    out2 = jax.block_until_ready(rel_to_abs_index(rel2, init2, nw2, nh2))
    assert jnp.array_equal(out2, _reference(rel2, init2, nw2, nh2))

    print("KERNEL_OK")
</pallas_src>

<mosaic_0001>
module attributes {stable_mosaic.version = 11 : i64} {
  func.func @_rel_to_abs_kernel(%arg0: i32, %arg1: i32, %arg2: memref<1x16x16xf32, #tpu.memory_space<vmem>>, %arg3: memref<1x16x16xf32, #tpu.memory_space<vmem>>, %arg4: memref<1x16x16xf32, #tpu.memory_space<vmem>>) attributes {dimension_semantics = [#tpu.dimension_semantics<parallel>, #tpu.dimension_semantics<arbitrary>], iteration_bounds = array<i64: 1, 2>, scalar_prefetch = 0 : i64, scratch_operands = 0 : i64, tpu.core_type = #tpu.core_type<tc>, window_params = [{transform_indices = @transform_0, window_bounds = array<i64: 1, 16, 16>}, {transform_indices = @transform_1, window_bounds = array<i64: 1, 16, 16>}, {transform_indices = @transform_2, window_bounds = array<i64: 1, 16, 16>}]} {
    %c0 = arith.constant 0 : index
    %c0_0 = arith.constant 0 : index
    %c0_1 = arith.constant 0 : index
    %0 = vector.load %arg2[%c0, %c0_0, %c0_1] : memref<1x16x16xf32, #tpu.memory_space<vmem>>, vector<1x16x16xf32>
    %1 = arith.fptosi %0 : vector<1x16x16xf32> to vector<1x16x16xi32>
    %c0_2 = arith.constant 0 : index
    %c0_3 = arith.constant 0 : index
    %c0_4 = arith.constant 0 : index
    %2 = vector.load %arg3[%c0_2, %c0_3, %c0_4] : memref<1x16x16xf32, #tpu.memory_space<vmem>>, vector<1x16x16xf32>
    %3 = arith.fptosi %2 : vector<1x16x16xf32> to vector<1x16x16xi32>
    %c3_i32 = arith.constant 3 : i32
    %4 = vector.broadcast %c3_i32 : i32 to vector<1x16x16xi32>
    %5 = arith.cmpi sge, %1, %4 : vector<1x16x16xi32>
    %6 = arith.extui %5 : vector<1x16x16xi1> to vector<1x16x16xi32>
    %c6_i32 = arith.constant 6 : i32
    %7 = vector.broadcast %c6_i32 : i32 to vector<1x16x16xi32>
    %8 = arith.cmpi sge, %1, %7 : vector<1x16x16xi32>
    %9 = arith.extui %8 : vector<1x16x16xi1> to vector<1x16x16xi32>
    %10 = arith.addi %6, %9 : vector<1x16x16xi32>
    %c1_i32 = arith.constant 1 : i32
    %11 = vector.broadcast %c1_i32 : i32 to vector<1x16x16xi32>
    %12 = arith.subi %10, %11 : vector<1x16x16xi32>
    %c3_i32_5 = arith.constant 3 : i32
    %13 = vector.broadcast %c3_i32_5 : i32 to vector<1x16x16xi32>
    %14 = arith.muli %13, %10 : vector<1x16x16xi32>
    %15 = arith.subi %1, %14 : vector<1x16x16xi32>
    %c1_i32_6 = arith.constant 1 : i32
    %16 = vector.broadcast %c1_i32_6 : i32 to vector<1x16x16xi32>
    %17 = arith.subi %15, %16 : vector<1x16x16xi32>
    %c4_i32 = arith.constant 4 : i32
    %18 = vector.broadcast %c4_i32 : i32 to vector<1x16x16xi32>
    %19 = arith.muli %12, %18 : vector<1x16x16xi32>
    %20 = arith.addi %3, %19 : vector<1x16x16xi32>
    %c16_i32 = arith.constant 16 : i32
    %21 = vector.broadcast %c16_i32 : i32 to vector<1x16x16xi32>
    %22 = arith.cmpi sge, %20, %21 : vector<1x16x16xi32>
    %c-1_i32 = arith.constant -1 : i32
    %23 = vector.broadcast %c-1_i32 : i32 to vector<1x16x16xi32>
    %24 = arith.cmpi sle, %20, %23 : vector<1x16x16xi32>
    %25 = arith.ori %22, %24 : vector<1x16x16xi1>
    %26 = arith.select %25, %3, %20 : vector<1x16x16xi1>, vector<1x16x16xi32>
    %c4_i32_7 = arith.constant 4 : i32
    %c0_i32 = arith.constant 0 : i32
    %27 = arith.cmpi eq, %c4_i32_7, %c0_i32 : i32
    %c1_i32_8 = arith.constant 1 : i32
    %28 = arith.select %27, %c1_i32_8, %c4_i32_7 : i32
    %29 = vector.broadcast %28 : i32 to vector<1x16x16xi32>
    %30 = arith.remsi %3, %29 : vector<1x16x16xi32>
    %c0_i32_9 = arith.constant 0 : i32
    %31 = vector.broadcast %c0_i32_9 : i32 to vector<1x16x16xi32>
    %32 = arith.cmpi ne, %30, %31 : vector<1x16x16xi32>
    %c0_i32_10 = arith.constant 0 : i32
    %33 = vector.broadcast %c0_i32_10 : i32 to vector<1x16x16xi32>
    %34 = arith.cmpi slt, %30, %33 : vector<1x16x16xi32>
    %c0_i32_11 = arith.constant 0 : i32
    %35 = arith.cmpi slt, %28, %c0_i32_11 : i32
    %36 = vector.broadcast %35 : i1 to vector<1x16x16xi1>
    %37 = vector.broadcast %36 : vector<1x16x16xi1> to vector<1x16x16xi1>
    %38 = arith.xori %34, %37 : vector<1x16x16xi1>
    %39 = arith.andi %38, %32 : vector<1x16x16xi1>
    %40 = vector.broadcast %28 : i32 to vector<1x16x16xi32>
    %41 = arith.addi %30, %40 : vector<1x16x16xi32>
    %42 = arith.select %39, %41, %30 : vector<1x16x16xi1>, vector<1x16x16xi32>
    %c3_i32_12 = arith.constant 3 : i32
    %43 = vector.broadcast %c3_i32_12 : i32 to vector<1x16x16xi32>
    %44 = arith.cmpi eq, %42, %43 : vector<1x16x16xi32>
    %c1_i32_13 = arith.constant 1 : i32
    %45 = vector.broadcast %c1_i32_13 : i32 to vector<1x16x16xi32>
    %46 = arith.cmpi eq, %17, %45 : vector<1x16x16xi32>
    %47 = arith.andi %44, %46 : vector<1x16x16xi1>
    %c0_i32_14 = arith.constant 0 : i32
    %48 = vector.broadcast %c0_i32_14 : i32 to vector<1x16x16xi32>
    %49 = arith.cmpi eq, %42, %48 : vector<1x16x16xi32>
    %c-1_i32_15 = arith.constant -1 : i32
    %50 = vector.broadcast %c-1_i32_15 : i32 to vector<1x16x16xi32>
    %51 = arith.cmpi eq, %17, %50 : vector<1x16x16xi32>
    %52 = arith.andi %49, %51 : vector<1x16x16xi1>
    %53 = arith.ori %47, %52 : vector<1x16x16xi1>
    %c0_i32_16 = arith.constant 0 : i32
    %54 = vector.broadcast %c0_i32_16 : i32 to vector<1x16x16xi32>
    %55 = arith.select %53, %54, %17 : vector<1x16x16xi1>, vector<1x16x16xi32>
    %56 = arith.addi %26, %55 : vector<1x16x16xi32>
    %c0_i32_17 = arith.constant 0 : i32
    %57 = vector.broadcast %c0_i32_17 : i32 to vector<1x16x16xi32>
    %58 = arith.cmpi sge, %56, %57 : vector<1x16x16xi32>
    %c16_i32_18 = arith.constant 16 : i32
    %59 = vector.broadcast %c16_i32_18 : i32 to vector<1x16x16xi32>
    %60 = arith.cmpi slt, %56, %59 : vector<1x16x16xi32>
    %61 = arith.andi %58, %60 : vector<1x16x16xi1>
    %62 = arith.select %61, %56, %26 : vector<1x16x16xi1>, vector<1x16x16xi32>
    %63 = arith.sitofp %62 : vector<1x16x16xi32> to vector<1x16x16xf32>
    %c0_19 = arith.constant 0 : index
    %c0_20 = arith.constant 0 : index
    %c0_21 = arith.constant 0 : index
    %64 = vector.load %arg4[%c0_19, %c0_20, %c0_21] : memref<1x16x16xf32, #tpu.memory_space<vmem>>, vector<1x16x16xf32>
    tpu.vector_store %arg4[%c0_19, %c0_20, %c0_21], %63 {strides = array<i32>} : memref<1x16x16xf32, #tpu.memory_space<vmem>>, vector<1x16x16xf32>,
    return
  }
  func.func @transform_0(%arg0: i32, %arg1: i32) -> (i32, i32, i32) {
    %c0_i32 = arith.constant 0 : i32
    %c0_i32_0 = arith.constant 0 : i32
    return %arg1, %arg0, %c0_i32 : i32, i32, i32
  }
  func.func @transform_1(%arg0: i32, %arg1: i32) -> (i32, i32, i32) {
    %c0_i32 = arith.constant 0 : i32
    %c0_i32_0 = arith.constant 0 : i32
    %c0_i32_1 = arith.constant 0 : i32
    return %c0_i32, %arg0, %c0_i32_0 : i32, i32, i32
  }
  func.func @transform_2(%arg0: i32, %arg1: i32) -> (i32, i32, i32) {
    %c0_i32 = arith.constant 0 : i32
    %c0_i32_0 = arith.constant 0 : i32
    return %arg1, %arg0, %c0_i32 : i32, i32, i32
  }
}

</mosaic_0001>

<bundles_post_ra>
// kernel: tpu_custom_call.1
= control target key start
LH: loop header
LB: loop body
LE: loop exit
PB: predicated region body
PF: predicated region fallthrough
CT: control target
= control target key end

     0   :  { %7 = vsyncpa [#allocation3], 0  ;;  %s888_s0 = inlined_call_operand.hbm [shape: f32[2,16,16], index: 0, kind: input, shape index: {}]   ;;  %s889_s1 = inlined_call_operand.hbm [shape: f32[1,16,16], index: 1, kind: input, shape index: {}]   ;;  %s890_s2 = inlined_call_operand.hbm [shape: f32[2,16,16], index: 2, kind: output, shape index: {}]  }
   0x1   :  { %9 = vsyncpa [#allocation3 + $0x1], 0 }
   0x2   :  { %10 = vsyncpa [#allocation6], 0 }
   0x3   :  { %11 = vsyncpa [#allocation4], 0 }
   0x4   :  { %13 = vsyncpa [#allocation4 + $0x1], 0  ;;  %s688_s9 = smov 0   ;;  %s690_s10 = smov 0  }
   0x5   :  { %s692_s11 = smov 0   ;;  %s694_s12 = smov 0  }
   0x6   :  { %s696_s13 = smov 0   ;;  %s698_s14 = smov 0  }
   0x7 LB: > { %s414_s15 = sadd.s32 4294967295, %s663_s14   ;;  %s415_s16 = sadd.s32 4294967294, %s663_s14   ;;  %s663_s14 = sphi %s698_s14, %s19_s14   ;;  %s659_s13 = sphi %s696_s13, %s910_s13   ;;  %s655_s12 = sphi %s694_s12, %s909_s12   ;;  %s651_s11 = sphi %s692_s11, %s908_s11   ;;  %s647_s10 = sphi %s690_s10, %s907_s10   ;;  %s643_s9 = sphi %s688_s9, %s906_s9  }
   0x8   : > { %p53_p0 = scmp.ne.s32.totalorder %s647_s10, %s643_s9  ;;  %p722_p1 = scmp.eq.s32.totalorder %s414_s15, 0 }
   0x9   : > { %p726_p2 = scmp.eq.s32.totalorder %s414_s15, 1  ;;  %p111_p3 = scmp.eq.s32.totalorder %s415_s16, 1 }
   0xa   : > { %p732_p4 = por %p722_p1, %p53_p0  ;;  %p416_p5 = scmp.ge.s32.totalorder %s663_s14, 1 }
   0xb   : > { %p737_p6 = por %p111_p3, %p53_p0  ;;  %p118_p7 = scmp.lt.s32.totalorder %s663_s14, 3 }
   0xc   : > { %s895_s19 = scalar_select %p732_p4, 1, 0 }
   0xd   : > { %s896_s20 = scalar_select %p737_p6, 1, 0 }
   0xe   : > { %p742_p8 = pnand %p416_p5, %p118_p7  ;;  %s665_s22 = smov [#allocation5]  }
   0xf   : > { %s133_s23 = sshll.u32 %s665_s22, 4  ;;  %s28_s25 = sadd.s32 1, %s659_s13  ;;  %s134_s23 = int_to_ptr.vmem [resolvable:$true] %s133_s23 }
  0x10   : > { %p455_p9 = pneg %p742_p8  ;;  %s536_s26 = scalar_lea.vmem %s134_s23, 256 }
  0x11   : > { %p537_p13 = scmp.ne.s32.totalorder %s134_s23, %s536_s26  ;;  %p544_p5 = scmp.lt.s32.totalorder %s134_s23, %s134_s23 }
  0x12   : > { %p751_p11 = pnand %p455_p9, %p722_p1  ;;  %p545_p7 = scmp.lt.s32.totalorder %s536_s26, %s536_s26 }
  0x14   : > { %p527_p12 = pneg %p751_p11  ;;  %p546_p6 = por %p545_p7, %p544_p5 }
  0x16   : > { %p539_p0 = pnand %p537_p13, %p527_p12 }
  0x18   : > { %p540_p3 = pneg %p539_p0 }
  0x1a   : > { %p547_p4 = pnand %p546_p6, %p540_p3 }
  0x1c   : > { %550 = shalt.err (!%p547_p4)
}
  0x1d   : > { %s892_s27 = smov 128   ;;  %s667_s28 = smov 8  }
  0x1e   : > { %458 = dma.hbm_to_vmem [thread:$0]  (!%p751_p11), %s889_s1, 256, %s134_s23, [#allocation6], %s892_s27, %s892_s27, %s667_s28  }
  0x1f   : > { %p29_p4 = scmp.ge.s32.totalorder %s28_s25, 2  ;;  %s40_s3 = sadd.s32 1, %s651_s11 }
  0x20   : > { %p47_p6 = scmp.ne.s32.totalorder %s651_s11, %s647_s10  ;;  %p48_p9 = scmp.eq.s32.totalorder %s663_s14, 0 }
  0x21   : > { %s912_s25 = smov (%p29_p4, %s28_s25), 0  ;;  %p468_p0 = scmp.lt.s32.totalorder %s663_s14, 2 }
  0x22   : > { %p772_p12 = por %p48_p9, %p47_p6  ;;  %p778_p13 = por %p726_p2, %p47_p6 }
  0x23   : > { %s35_s6 = ssub.s32 %s659_s13, %s912_s25  ;;  %s147_s7 = sand.u32 1, %s651_s11  }
  0x24   : > { %p38_p11 = scmp.eq.s32.totalorder %s35_s6, 0  ;;  %s419_s8 = sshll.u32 %s147_s7, 4 }
  0x25   : > { %s437_s16 = sshll.u32 %s659_s13, 8  ;;  %s151_s26 = scalar_lea.vmem [#allocation2], %s419_s8 }
  0x26   : > { %s787_s15 = scalar_select %p38_p11, %s651_s11, %s40_s3  }
  0x27   : > { %s159_s24 = scalar_lea.hbm %s888_s0, %s437_s16  ;;  %s160_s29 = sshll.u32 %s151_s26, 4  ;;  %s161_s29 = int_to_ptr.vmem [resolvable:$true] %s160_s29 }
  0x28   : > { %p795_p2 = pnand %p468_p0, %p772_p12  ;;  %s148_s30 = scalar_lea.sflag [#allocation3], %s147_s7 }
  0x29   : > { %s564_s6 = scalar_lea.vmem %s161_s29, 256  ;;  %s668_s3 = smov [#allocation2]  }
  0x2a   : > { %p553_p3 = pneg %p795_p2  ;;  %p565_p5 = scmp.ne.s32.totalorder %s161_s29, %s564_s6 }
  0x2b   : > { %s569_s27 = sshll.u32 %s668_s3, 4  ;;  %s570_s27 = int_to_ptr.vmem [resolvable:$false] %s569_s27 }
  0x2c   : > { %p567_p7 = pnand %p565_p5, %p553_p3  ;;  %s571_s16 = scalar_lea.vmem %s570_s27, 512 }
  0x2d   : > { %p572_p6 = scmp.lt.s32.totalorder %s161_s29, %s570_s27  ;;  %p573_p9 = scmp.lt.s32.totalorder %s571_s16, %s564_s6 }
  0x2e   : > { %p568_p4 = pneg %p567_p7 }
  0x2f   : > { %p574_p11 = por %p573_p9, %p572_p6 }
  0x31   : > { %p575_p10 = pnand %p574_p11, %p568_p4 }
  0x33   : > { %578 = shalt.err (!%p575_p10)
}
  0x34   : > { %s902_s4 = smov 128   ;;  %172 = sbr.rel (%p742_p8) target bundleno = 108 (0x6c), region = 28 }
  0x35   : > { %462 = dma.hbm_to_vmem [thread:$0]  (!%p795_p2), %s159_s24, 256, %s161_s29, %s148_s30, %s902_s4, %s902_s4, %s667_s28  }
  0x36   : > { %s809_s7 = sand.u32 (!%p742_p8), 1, %s647_s10   ;;  %p903_p10 = scmp.ne.s32.totalorder (!%p742_p8), %s895_s19, 0 }
  0x37   : > { %s423_s27 = sshll.u32 (!%p742_p8), %s809_s7, 4  ;;  %s175_s8 = scalar_lea.sflag (!%p742_p8), [#allocation3], %s809_s7 }
  0x38   : > { %s178_s22 = scalar_lea.vmem (!%p742_p8), [#allocation2], %s423_s27 }
  0x39   : > { %630 = dma.done.wait (%p903_p10), %s175_s8, 256  }
  0x3a   : > { %632 = vsyncadd (%p903_p10), %s175_s8, 4294967040 }
  0x3b   : > { %634 = dma.done.wait (%p722_p1), [#allocation6], 256  }
  0x3c   : > { %636 = vsyncadd (%p722_p1), [#allocation6], 4294967040  ;;  %v206_v0 = vld [vmem:[%s178_s22] sm:$0xff]  ;;  %v207_v2 = vld [vmem:[%s178_s22 + $0x8] sm:$0xff]  ;;  %v669_v13 = vmov 0   ;;  %s202_s17 = scalar_lea.vmem [#allocation7], %s423_s27 }
  0x3d   : > { %v210_v1 = vld [vmem:[#allocation5] sm:$0xff]  ;;  %v439_v3 = vtrunc.f32 %v206_v0  ;;  %v441_v5 = vtrunc.f32 %v207_v2  ;;  %v211_v6 = vld [vmem:[#allocation5 + $0x8] sm:$0xff]  ;;  %s315_s19 = sshll.u32 %s202_s17, 4  ;;  %s438_s21 = sshll.u32 %s655_s12, 8  ;;  %s834_s19 = int_to_ptr.vmem [resolvable:$true] %s315_s19 }
  0x3e   : > { %v443_v4 = vtrunc.f32 %v210_v1  ;;  %v445_v7 = vtrunc.f32 %v211_v6  ;;  %s839_s24 = scalar_lea.hbm %s890_s2, %s438_s21  ;;  %s300_s26 = scalar_lea.sflag [#allocation4], %s809_s7 }
  0x3f   : > { %v440_v8 = vcvt.f32.s32 %v439_v3  ;;  %v442_v10 = vcvt.f32.s32 %v441_v5  ;;  %s579_s29 = scalar_lea.vmem %s834_s19, 256  ;;  %s670_s12 = smov [#allocation7]  }
  0x40   : > { %v444_v9 = vcvt.f32.s32 %v443_v4  ;;  %v823_v11 = vcvt.f32.s32 %v445_v7  ;;  %p580_p1 = scmp.ne.s32.totalorder %s834_s19, %s579_s29  ;;  %s583_s18 = sshll.u32 %s670_s12, 4  ;;  %s584_s18 = int_to_ptr.vmem [resolvable:$false] %s583_s18 }
  0x41   : > { %vm214_vm0 = vcmp.ge.s32.totalorder %v440_v8, 3  ;;  %vm218_vm1 = vcmp.ge.s32.totalorder %v440_v8, 6  ;;  %vm215_vm2 = vcmp.ge.s32.totalorder %v442_v10, 3  ;;  %vm219_vm3 = vcmp.ge.s32.totalorder %v442_v10, 6  ;;  %s585_s30 = scalar_lea.vmem %s584_s18, 512  ;;  %p586_p0 = scmp.lt.s32.totalorder %s834_s19, %s584_s18 }
  0x42   : > { %v245_v12 = vsub.s32 0, %v444_v9  ;;  %v216_v14 = vsel %vm214_vm0, 1, %v669_v13  ;;  %v220_v15 = vsel %vm218_vm1, 1, %v669_v13  ;;  %v217_v18 = vsel %vm215_vm2, 1, %v669_v13  ;;  %p581_p8 = pnand %p580_p1, %p778_p13  ;;  %p587_p2 = scmp.lt.s32.totalorder %s585_s30, %s579_s29 }
  0x43   : > { %v222_v16 = vadd.s32 %v220_v15, %v216_v14  ;;  %v221_v19 = vsel %vm219_vm3, 1, %v669_v13  ;;  %v252_v21 = vsub.s32 0, %v823_v11  ;;  %vm244_vm4 = vcmp.lt.s32.totalorder %v444_v9, 0 }
  0x44   : > { %v430_v17 = vmin.u32 %v444_v9, %v245_v12  ;;  %v223_v20 = vadd.s32 %v221_v19, %v217_v18  ;;  %vm251_vm11 = vcmp.lt.s32.totalorder %v823_v11, 0  ;;  %p582_p12 = pneg %p581_p8  ;;  %p588_p3 = por %p587_p2, %p586_p0 }
  0x45   : > { %v426_v22 = vadd.s32 4294967295, %v222_v16  ;;  %v226_v23 = vmul.u32 3, %v222_v16  ;;  %v431_v27 = vmin.u32 %v823_v11, %v252_v21 }
  0x46   : > { %v248_v24 = vand.u32 3, %v430_v17  ;;  %v427_v25 = vadd.s32 4294967295, %v223_v20  ;;  %v227_v26 = vmul.u32 3, %v223_v20  ;;  %p589_p5 = pnand %p588_p3, %p582_p12 }
  0x47   : > { %v228_v28 = vsub.s32 %v440_v8, %v226_v23  ;;  %v232_v29 = vmul.u32 4, %v426_v22  ;;  %v255_v31 = vand.u32 3, %v431_v27 }
  0x48   : > { %v249_v30 = vsub.s32 0, %v248_v24  ;;  %v233_v35 = vmul.u32 4, %v427_v25  ;;  %v229_v37 = vsub.s32 %v442_v10, %v227_v26 }
  0x49   : > { %v428_v32 = vadd.s32 4294967295, %v228_v28  ;;  %v234_v33 = vadd.s32 %v444_v9, %v232_v29  ;;  %v256_v39 = vsub.s32 0, %v255_v31 }
  0x4a   : > { %v250_v34 = vsel %vm244_vm4, %v249_v30, %v248_v24  ;;  %v235_v40 = vadd.s32 %v823_v11, %v233_v35  ;;  %v429_v41 = vadd.s32 4294967295, %v229_v37 }
  0x4b   : > { %vm258_vm5 = vcmp.ne.s32.totalorder %v250_v34, 0  ;;  %vm260_vm6 = vcmp.lt.s32.totalorder %v250_v34, 0  ;;  %v264_v36 = vadd.s32 4, %v250_v34  ;;  %vm236_vm7 = vcmp.ge.s32.totalorder %v234_v33, 16 }
  0x4c   : > { %vm238_vm8 = vcmp.le.s32.totalorder %v234_v33, 4294967295  ;;  %vm262_vm9 = vmand %vm260_vm6, %vm258_vm5  ;;  %vm270_vm10 = vcmp.eq.s32.totalorder %v428_v32, 1  ;;  %vm276_vm13 = vcmp.eq.s32.totalorder %v428_v32, 4294967295  ;;  %v257_v42 = vsel %vm251_vm11, %v256_v39, %v255_v31 }
  0x4d   : > { %vm240_vm12 = vmor %vm236_vm7, %vm238_vm8  ;;  %v266_v38 = vsel %vm262_vm9, %v264_v36, %v250_v34  ;;  %vm259_vm2 = vcmp.ne.s32.totalorder %v257_v42, 0  ;;  %vm261_vm3 = vcmp.lt.s32.totalorder %v257_v42, 0  ;;  %v265_v44 = vadd.s32 4, %v257_v42 }
  0x4e   : > { %vm268_vm14 = vcmp.eq.s32.totalorder %v266_v38, 3  ;;  %vm274_vm15 = vcmp.eq.s32.totalorder %v266_v38, 0  ;;  %v242_v43 = vsel %vm240_vm12, %v444_v9, %v234_v33  ;;  %vm237_vm5 = vcmp.ge.s32.totalorder %v235_v40, 16  ;;  %vm263_vm7 = vmand %vm261_vm3, %vm259_vm2 }
  0x4f   : > { %vm272_vm0 = vmand %vm268_vm14, %vm270_vm10  ;;  %vm239_vm6 = vcmp.le.s32.totalorder %v235_v40, 4294967295  ;;  %v267_v47 = vsel %vm263_vm7, %v265_v44, %v257_v42  ;;  %vm271_vm8 = vcmp.eq.s32.totalorder %v429_v41, 1  ;;  %vm277_vm9 = vcmp.eq.s32.totalorder %v429_v41, 4294967295 }
  0x50   : > { %vm278_vm1 = vmand %vm274_vm15, %vm276_vm13  ;;  %vm269_vm12 = vcmp.eq.s32.totalorder %v267_v47, 3  ;;  %vm275_vm13 = vcmp.eq.s32.totalorder %v267_v47, 0 }
  0x51   : > { %vm280_vm4 = vmor %vm272_vm0, %vm278_vm1  ;;  %vm296_vm0 = vcmask 130048  }
  0x52   : > { %v282_v45 = vsel %vm280_vm4, 0, %v428_v32  ;;  %vm241_vm11 = vmor %vm237_vm5, %vm239_vm6 }
  0x53   : > { %v284_v46 = vadd.s32 %v282_v45, %v242_v43  ;;  %vm273_vm1 = vmand %vm269_vm12, %vm271_vm8  ;;  %v243_v50 = vsel %vm241_vm11, %v823_v11, %v235_v40 }
  0x54   : > { %vm279_vm4 = vmand %vm275_vm13, %vm277_vm9 }
  0x55   : > { %vm286_vm10 = vcmp.ge.s32.totalorder %v284_v46, 0  ;;  %vm288_vm14 = vcmp.lt.s32.totalorder %v284_v46, 16  ;;  %vm281_vm2 = vmor %vm273_vm1, %vm279_vm4 }
  0x56   : > { %vm290_vm15 = vmand %vm286_vm10, %vm288_vm14  ;;  %v283_v51 = vsel %vm281_vm2, 0, %v429_v41 }
  0x57   : > { %v292_v48 = vsel %vm290_vm15, %v284_v46, %v242_v43  ;;  %v285_v52 = vadd.s32 %v283_v51, %v243_v50 }
  0x58   : > { %v294_v49 = vcvt.s32.f32 %v292_v48 }
  0x59   : > { %vm287_vm3 = vcmp.ge.s32.totalorder %v285_v52, 0  ;;  %vm289_vm5 = vcmp.lt.s32.totalorder %v285_v52, 16 }
  0x5a   : > { %297 = vst.msk [vmem:[%s202_s17] sm:$0xff] %vm296_vm0, %v294_v49  ;;  %vm291_vm6 = vmand %vm287_vm3, %vm289_vm5 }
  0x5b   : > { %v293_v53 = vsel %vm291_vm6, %v285_v52, %v243_v50 }
  0x5c   : > { %v295_v54 = vcvt.s32.f32 %v293_v53 }
  0x5e   : > { %298 = vst.msk [vmem:[%s202_s17 + $0x8] sm:$0xff] %vm296_vm0, %v295_v54 }
  0x5f   : > { %592 = shalt.err (!%p589_p5)
}
  0x60   : > { %s593_s6 = scalar_lea.hbm %s839_s24, 256  ;;  %s597_s4 = scalar_lea.hbm %s890_s2, 512 }
  0x61   : > { %p594_p7 = scmp.ne.s32.totalorder %s839_s24, %s593_s6  ;;  %p598_p9 = scmp.lt.s32.totalorder %s839_s24, %s890_s2 }
  0x62   : > { %p599_p11 = scmp.lt.s32.totalorder %s597_s4, %s593_s6 }
  0x63   : > { %p595_p4 = pnand %p594_p7, %p778_p13 }
  0x64   : > { %p600_p10 = por %p599_p11, %p598_p9 }
  0x65   : > { %p596_p6 = pneg %p595_p4 }
  0x67   : > { %p601_p1 = pnand %p600_p10, %p596_p6 }
  0x69   : > { %604 = shalt.err (!%p601_p1)
}
  0x6a   : > { %s671_s22 = smov 128   ;;  %s672_s17 = smov 8  }
  0x6b   : > { %453 = dma.vmem_to_hbm [thread:$0]  (%p778_p13), %s834_s19, 256, %s839_s24, %s300_s26, %s671_s22, %s671_s22, %s672_s17  }
  0x6c PF: > { %s330_s21 = sand.u32 1, %s643_s9   ;;  %p904_p8 = scmp.ne.s32.totalorder %s896_s20, 0 }
  0x6d   : > { %p905_p12 = scmp.ge.s32.totalorder %s663_s14, 2  ;;  %s331_s28 = scalar_lea.sflag [#allocation4], %s330_s21 }
  0x6f   : > { %p464_p0 = pnand %p905_p12, %p904_p8 }
  0x71   : > { %p465_p2 = pneg %p464_p0 }
  0x73   : > { %638 = dma.done.wait (%p465_p2), %s331_s28, 256  }
  0x74   : > { %640 = vsyncadd (%p465_p2), %s331_s28, 4294967040  ;;  %s19_s14 = sadd.s32 1, %s663_s14   ;;  %s906_s9 = smov %s647_s10 }
  0x75   : > { %p16_p3 = scmp.ge.s32.totalorder %s19_s14, 4   ;;  %s907_s10 = smov %s651_s11 }
  0x76   : > { %s908_s11 = smov %s787_s15  ;;  %s909_s12 = smov %s659_s13 }
  0x77   : > { %s910_s13 = smov %s912_s25  ;;  %18 = sbr.rel (!%p16_p3) target bundleno = 7 (0x7), region = 78 }
  0x7c   :  { %336 = vsyncpa [#allocation3], 1 }
  0x7d   :  { %338 = vsyncpa [#allocation3 + $0x1], 1 }
  0x7e   :  { %339 = vsyncpa [#allocation6], 1 }
  0x7f   :  { %340 = vsyncpa [#allocation4], 1 }
  0x80   :  { %342 = vsyncpa [#allocation4 + $0x1], 1 }

</bundles_post_ra>
